<compile_context>
chip_gen: v7x
topology: tpu7x:2x2x1
jax: 0.10.0
libtpu: 0.0.40
codegen_flags: <defaults>
</compile_context>

<pallas_src>
import functools

import jax
import jax.numpy as jnp
import numpy as np
from jax.experimental import pallas as pl
from jax.experimental.pallas import tpu as pltpu


def _spd_rectify_kernel(u_ref, s_ref, o_ref, *, epsilon):
    # u_ref: (TB, N, N) VMEM tile, f32  (left singular vectors per matrix)
    # s_ref: (TB, 1, N) VMEM tile, f32  (singular values as lane-major rows)
    # o_ref: (TB, N, N) VMEM tile       (rectified SPD matrices)
    u = u_ref[...]                                   # (TB, N, N)
    s = s_ref[...]                                   # (TB, 1, N)
    s_clamped = jnp.maximum(s, jnp.float32(epsilon)) # rectify the spectrum
    # u @ diag(s): scale column j of each u_b by s_b[j] (broadcast over rows).
    us = u * s_clamped                               # (TB, N, N)
    # Batched (u*s) @ u^T via contraction on the LAST axis of both operands:
    # no in-kernel transpose / XLU pass, MXU does A.B^T directly per batch.
    out = jnp.einsum("bij,bkj->bik", us, u,
                     preferred_element_type=jnp.float32)
    o_ref[...] = out.astype(o_ref.dtype)


def spd_rectified_forward(x, epsilon=1e-4):
    """SPDRectified forward. x: (B, N, N) symmetric positive (semi-)definite."""
    B, N, _ = x.shape
    out_dtype = x.dtype

    # ---- glue: batched SVD in f32 (matches torch x.svd(); only u, s used) ----
    x32 = x.astype(jnp.float32)
    u, s, _ = jnp.linalg.svd(x32)          # u: (B, N, N) f32, s: (B, N) f32

    # ---- choose how many matrices to process per grid step ----------------
    # ~256 KiB of u per block at most; keep >= 2 grid steps when possible so
    # the "parallel" batch axis can be sharded across v7x's two TensorCores.
    tb = max(1, min(B, 65536 // max(N * N, 1)))
    if B > 1:
        tb = min(tb, pl.cdiv(B, 2))
    n_steps = pl.cdiv(B, tb)
    B_pad = n_steps * tb

    u_k = u
    s_k = s
    if B_pad != B:
        pad = B_pad - B
        u_k = jnp.concatenate([u_k, jnp.zeros((pad, N, N), jnp.float32)], axis=0)
        s_k = jnp.concatenate([s_k, jnp.ones((pad, N), jnp.float32)], axis=0)
    s_k = s_k.reshape(B_pad, 1, N)

    grid_spec = pltpu.PrefetchScalarGridSpec(
        num_scalar_prefetch=0,
        grid=(n_steps,),
        in_specs=[
            pl.BlockSpec((tb, N, N), lambda b: (b, 0, 0)),   # u
            pl.BlockSpec((tb, 1, N), lambda b: (b, 0, 0)),   # s
        ],
        out_specs=pl.BlockSpec((tb, N, N), lambda b: (b, 0, 0)),
    )

    itemsize_out = jnp.dtype(out_dtype).itemsize
    cost = pl.CostEstimate(
        flops=int(2 * B_pad * N * N * N + B_pad * N * N),
        transcendentals=0,
        bytes_accessed=int(B_pad * N * N * 4          # u in
                           + B_pad * N * 4            # s in
                           + B_pad * N * N * itemsize_out),  # out
    )

    out = pl.pallas_call(
        functools.partial(_spd_rectify_kernel, epsilon=float(epsilon)),
        out_shape=jax.ShapeDtypeStruct((B_pad, N, N), out_dtype),
        grid_spec=grid_spec,
        compiler_params=pltpu.CompilerParams(
            dimension_semantics=("parallel",)),
        cost_estimate=cost,
    )(u_k, s_k)

    return out[:B]


if __name__ == "__main__":
    key = jax.random.PRNGKey(0)
    B, N = 8, 16
    epsilon = 1e-4

    # Deterministic SPD inputs: x = A @ A.T  (symmetric PSD).
    a = jax.random.normal(key, (B, N, N), dtype=jnp.float32)
    x = jnp.einsum("bik,bjk->bij", a, a)

    out = spd_rectified_forward(x, epsilon=epsilon)
    out = jax.block_until_ready(out)

    # Reference of the same math in float64 (from the same SVD factors).
    u_ref, s_ref, _ = jnp.linalg.svd(x)
    u_h = np.asarray(u_ref, dtype=np.float64)
    s_h = np.maximum(np.asarray(s_ref, dtype=np.float64), epsilon)
    ref = np.einsum("bij,bj,bkj->bik", u_h, s_h, u_h)

    assert out.shape == (B, N, N) and out.dtype == x.dtype
    np.testing.assert_allclose(np.asarray(out), ref, rtol=2e-4, atol=2e-4)
    print("KERNEL_OK")
</pallas_src>

<mosaic_0001>
module attributes {stable_mosaic.version = 11 : i64} {
  func.func @_spd_rectify_kernel(%arg0: i32, %arg1: memref<4x16x16xf32, #tpu.memory_space<vmem>>, %arg2: memref<4x1x16xf32, #tpu.memory_space<vmem>>, %arg3: memref<4x16x16xf32, #tpu.memory_space<vmem>>) attributes {dimension_semantics = [#tpu.dimension_semantics<parallel>], iteration_bounds = array<i64: 2>, scalar_prefetch = 0 : i64, scratch_operands = 0 : i64, tpu.core_type = #tpu.core_type<tc>, window_params = [{transform_indices = @transform_0, window_bounds = array<i64: 4, 16, 16>}, {transform_indices = @transform_1, window_bounds = array<i64: 4, 1, 16>}, {transform_indices = @transform_2, window_bounds = array<i64: 4, 16, 16>}]} {
    %c0 = arith.constant 0 : index
    %c0_0 = arith.constant 0 : index
    %c0_1 = arith.constant 0 : index
    %0 = vector.load %arg1[%c0, %c0_0, %c0_1] : memref<4x16x16xf32, #tpu.memory_space<vmem>>, vector<4x16x16xf32>
    %c0_2 = arith.constant 0 : index
    %c0_3 = arith.constant 0 : index
    %c0_4 = arith.constant 0 : index
    %1 = vector.load %arg2[%c0_2, %c0_3, %c0_4] : memref<4x1x16xf32, #tpu.memory_space<vmem>>, vector<4x1x16xf32>
    %cst = arith.constant 9.99999974E-5 : f32
    %2 = vector.broadcast %cst : f32 to vector<4x1x16xf32>
    %3 = arith.maximumf %1, %2 : vector<4x1x16xf32>
    %4 = vector.broadcast %3 : vector<4x1x16xf32> to vector<4x16x16xf32>
    %5 = arith.mulf %0, %4 : vector<4x16x16xf32>
    "tpu.trace_start"() <{level = 10 : i32, message = "bij,bkj->bik"}> : () -> ()
    %cst_5 = arith.constant dense<0.000000e+00> : vector<4x16x16xf32>
    %6 = tpu.matmul %5, %0, %cst_5 {dimension_numbers = #tpu.dot_dimension_numbers<[2], [2], [1], [1], [0, 0, 0, 1, 1, 1], [0], [0]>} : vector<4x16x16xf32>, vector<4x16x16xf32>, vector<4x16x16xf32> -> vector<4x16x16xf32>
    "tpu.trace_stop"() : () -> ()
    %c0_6 = arith.constant 0 : index
    %c0_7 = arith.constant 0 : index
    %c0_8 = arith.constant 0 : index
    %7 = vector.load %arg3[%c0_6, %c0_7, %c0_8] : memref<4x16x16xf32, #tpu.memory_space<vmem>>, vector<4x16x16xf32>
    tpu.vector_store %arg3[%c0_6, %c0_7, %c0_8], %6 {strides = array<i32>} : memref<4x16x16xf32, #tpu.memory_space<vmem>>, vector<4x16x16xf32>,
    return
  }
  func.func @transform_0(%arg0: i32) -> (i32, i32, i32) {
    %c0_i32 = arith.constant 0 : i32
    %c0_i32_0 = arith.constant 0 : i32
    %c0_i32_1 = arith.constant 0 : i32
    return %arg0, %c0_i32, %c0_i32_0 : i32, i32, i32
  }
  func.func @transform_1(%arg0: i32) -> (i32, i32, i32) {
    %c0_i32 = arith.constant 0 : i32
    %c0_i32_0 = arith.constant 0 : i32
    %c0_i32_1 = arith.constant 0 : i32
    return %arg0, %c0_i32, %c0_i32_0 : i32, i32, i32
  }
  func.func @transform_2(%arg0: i32) -> (i32, i32, i32) {
    %c0_i32 = arith.constant 0 : i32
    %c0_i32_0 = arith.constant 0 : i32
    %c0_i32_1 = arith.constant 0 : i32
    return %arg0, %c0_i32, %c0_i32_0 : i32, i32, i32
  }
}

</mosaic_0001>

<bundles_post_ra>
// kernel: tpu_custom_call.1
= control target key start
LH: loop header
LB: loop body
LE: loop exit
PB: predicated region body
PF: predicated region fallthrough
CT: control target
= control target key end

     0   :  { %7 = vsyncpa [#allocation3], 0  ;;  %s1308_s0 = inlined_call_operand.hbm [shape: f32[8,16,16], index: 0, kind: input, shape index: {}]   ;;  %s1309_s1 = inlined_call_operand.hbm [shape: f32[8,1,16], index: 1, kind: input, shape index: {}]   ;;  %s1310_s2 = inlined_call_operand.hbm [shape: f32[8,16,16], index: 2, kind: output, shape index: {}]  }
   0x1   :  { %9 = vsyncpa [#allocation3 + $0x1], 0 }
   0x2   :  { %10 = vsyncpa [#allocation6], 0 }
   0x3   :  { %12 = vsyncpa [#allocation6 + $0x1], 0 }
   0x4   :  { %13 = vsyncpa [#allocation4], 0 }
   0x5   :  { %15 = vsyncpa [#allocation4 + $0x1], 0  ;;  %s1044_s9 = smov 0   ;;  %s1046_s10 = smov 0  }
   0x6   :  { %s1048_s11 = smov 0   ;;  %s1050_s12 = smov 0  }
   0x7 LB: > { %s1065_s13 = sadd.s32 4294967295, %s1018_s12   ;;  %s722_s14 = sadd.s32 4294967294, %s1018_s12   ;;  %s1018_s12 = sphi %s1050_s12, %s1328_s12   ;;  %s1014_s11 = sphi %s1048_s11, %s1327_s11   ;;  %s1010_s10 = sphi %s1046_s10, %s1326_s10   ;;  %s1006_s9 = sphi %s1044_s9, %s1325_s9  }
   0x8   : > { %s1069_s15 = sadd.s32 1, %s1018_s12   ;;  %s28_s16 = sadd.s32 1, %s1014_s11 }
   0x9   : > { %s25_s17 = ssub.s32 %s1018_s12, %s1069_s15  ;;  %p35_p0 = scmp.ne.s32.totalorder %s1014_s11, %s1010_s10 }
   0xa   : > { %p26_p1 = scmp.eq.s32.totalorder %s25_s17, 0  ;;  %p36_p2 = scmp.eq.s32.totalorder %s1018_s12, 0 }
   0xb   : > { %p41_p3 = scmp.ne.s32.totalorder %s1010_s10, %s1006_s9  ;;  %p42_p4 = scmp.eq.s32.totalorder %s1065_s13, 0 }
   0xc   : > { %s1081_s18 = scalar_select %p26_p1, %s1014_s11, %s28_s16  }
   0xd   : > { %p1083_p5 = por %p36_p2, %p35_p0  ;;  %p1087_p6 = por %p42_p4, %p41_p3 }
   0xe   : > { %p91_p7 = scmp.eq.s32.totalorder %s1065_s13, 1  ;;  %p97_p8 = scmp.eq.s32.totalorder %s722_s14, 1 }
   0xf   : > { %s1314_s20 = scalar_select %p1087_p6, 1, 0 }
  0x10   : > { %p848_p10 = scmp.lt.s32.totalorder %s1018_s12, 2  ;;  %p1094_p11 = por %p91_p7, %p35_p0 }
  0x11   : > { %p1098_p12 = por %p97_p8, %p41_p3  ;;  %s1103_s23 = sand.u32 1, %s1014_s11  }
  0x12   : > { %s1315_s21 = scalar_select %p1094_p11, 1, 0 }
  0x13   : > { %s1316_s22 = scalar_select %p1098_p12, 1, 0 }
  0x14   : > { %s759_s24 = sshll.u32 %s1018_s12, 10  ;;  %s725_s25 = sshll.u32 %s1103_s23, 6 }
  0x15   : > { %s1110_s28 = scalar_lea.hbm %s1308_s0, %s759_s24  ;;  %s121_s29 = scalar_lea.vmem [#allocation2], %s725_s25 }
  0x16   : > { %s129_s30 = sshll.u32 %s121_s29, 4  ;;  %p1114_p13 = pnand %p848_p10, %p1083_p5  ;;  %s1118_s30 = int_to_ptr.vmem [resolvable:$true] %s129_s30 }
  0x17   : > { %s118_s4 = scalar_lea.sflag [#allocation3], %s1103_s23  ;;  %s888_s5 = scalar_lea.hbm %s1110_s28, 1024 }
  0x18   : > { %p889_p0 = scmp.ne.s32.totalorder %s1110_s28, %s888_s5  ;;  %p890_p1 = pneg %p1114_p13 }
  0x19   : > { %s893_s8 = scalar_lea.hbm %s1308_s0, 2048  ;;  %p894_p4 = scmp.lt.u32.totalorder %s1110_s28, %s1308_s0 }
  0x1a   : > { %p891_p2 = pnand %p890_p1, %p889_p0  ;;  %p895_p5 = scmp.lt.u32.totalorder %s893_s8, %s888_s5 }
  0x1b   : > { %p897_p8 = scmp.lt.u32.totalorder %s888_s5, %s1110_s28 }
  0x1c   : > { %p892_p3 = pneg %p891_p2  ;;  %p896_p7 = por %p895_p5, %p894_p4 }
  0x1e   : > { %p898_p10 = por %p897_p8, %p896_p7 }
  0x20   : > { %p899_p9 = pnand %p898_p10, %p892_p3 }
  0x22   : > { %902 = shalt.err (!%p899_p9)
}
  0x23   : > { %s903_s17 = scalar_lea.vmem %s1118_s30, 1024  ;;  %s1020_s19 = smov [#allocation2]  }
  0x24   : > { %p904_p0 = scmp.ne.s32.totalorder %s1118_s30, %s903_s17  ;;  %s908_s24 = sshll.u32 %s1020_s19, 4  ;;  %s909_s24 = int_to_ptr.vmem [resolvable:$false] %s908_s24 }
  0x25   : > { %s910_s25 = scalar_lea.vmem %s909_s24, 2048  ;;  %p911_p11 = scmp.lt.s32.totalorder %s1118_s30, %s909_s24 }
  0x26   : > { %p906_p2 = pnand %p904_p0, %p890_p1  ;;  %p912_p4 = scmp.lt.s32.totalorder %s910_s25, %s903_s17 }
  0x28   : > { %p907_p12 = pneg %p906_p2  ;;  %p913_p5 = por %p912_p4, %p911_p11 }
  0x2a   : > { %p914_p7 = pnand %p913_p5, %p907_p12 }
  0x2c   : > { %917 = shalt.err (!%p914_p7)
}
  0x2d   : > { %s1021_s26 = smov 128   ;;  %s1022_s27 = smov 8  }
  0x2e   : > { %840 = dma.hbm_to_vmem [thread:$0]  (!%p1114_p13), %s1110_s28, 1024, %s1118_s30, %s118_s4, %s1021_s26, %s1021_s26, %s1022_s27  }
  0x2f   : > { %p732_p9 = scmp.ge.s32.totalorder %s1018_s12, 1  ;;  %p158_p3 = scmp.lt.s32.totalorder %s1018_s12, 3 }
  0x30   : > { %s729_s29 = sshll.u32 %s1103_s23, 2  ;;  %s760_s6 = sshll.u32 %s1018_s12, 6 }
  0x31   : > { %p1151_p11 = pnand %p732_p9, %p158_p3  ;;  %s143_s7 = scalar_lea.vmem [#allocation5], %s729_s29 }
  0x32   : > { %s150_s8 = sshll.u32 %s143_s7, 4  ;;  %s1159_s17 = scalar_lea.hbm %s1309_s1, %s760_s6  ;;  %s1161_s8 = int_to_ptr.vmem [resolvable:$true] %s150_s8 }
  0x33   : > { %s140_s28 = scalar_lea.sflag [#allocation6], %s1103_s23  ;;  %s918_s30 = scalar_lea.hbm %s1159_s17, 64 }
  0x34   : > { %p919_p12 = scmp.ne.s32.totalorder %s1159_s17, %s918_s30  ;;  %s923_s24 = scalar_lea.hbm %s1309_s1, 128 }
  0x35   : > { %p924_p0 = scmp.lt.u32.totalorder %s1159_s17, %s1309_s1  ;;  %p925_p2 = scmp.lt.u32.totalorder %s923_s24, %s918_s30 }
  0x36   : > { %p921_p8 = pnand %p919_p12, %p890_p1  ;;  %p927_p5 = scmp.lt.u32.totalorder %s918_s30, %s1159_s17 }
  0x37   : > { %p926_p4 = por %p925_p2, %p924_p0 }
  0x38   : > { %p922_p10 = pneg %p921_p8 }
  0x39   : > { %p928_p7 = por %p927_p5, %p926_p4 }
  0x3b   : > { %p929_p9 = pnand %p928_p7, %p922_p10 }
  0x3d   : > { %932 = shalt.err (!%p929_p9)
}
  0x3e   : > { %s933_s27 = scalar_lea.vmem %s1161_s8, 64  ;;  %s1023_s29 = smov [#allocation5]  }
  0x3f   : > { %p934_p3 = scmp.ne.s32.totalorder %s1161_s8, %s933_s27  ;;  %s938_s6 = sshll.u32 %s1023_s29, 4  ;;  %s939_s6 = int_to_ptr.vmem [resolvable:$false] %s938_s6 }
  0x40   : > { %s940_s7 = scalar_lea.vmem %s939_s6, 128  ;;  %p941_p6 = scmp.lt.s32.totalorder %s1161_s8, %s939_s6 }
  0x41   : > { %p936_p12 = pnand %p934_p3, %p890_p1  ;;  %p942_p0 = scmp.lt.s32.totalorder %s940_s7, %s933_s27 }
  0x43   : > { %p937_p8 = pneg %p936_p12  ;;  %p943_p2 = por %p942_p0, %p941_p6 }
  0x45   : > { %p944_p4 = pnand %p943_p2, %p937_p8 }
  0x47   : > { %947 = shalt.err (!%p944_p4)
}
  0x48   : > { %s1024_s14 = smov 16   ;;  %s1025_s16 = smov 1  }
  0x49   : > { %843 = dma.hbm_to_vmem [thread:$0]  (!%p1114_p13), %s1159_s17, 64, %s1161_s8, %s140_s28, %s1024_s14, %s1024_s14, %s1025_s16  }
  0x4a   : > { %162 = sbr.rel (%p1151_p11) target bundleno = 334 (0x14e), region = 28  ;;  %s1192_s30 = sand.u32 (!%p1151_p11), 1, %s1010_s10  }
  0x4b   : > { %s733_s4 = sshll.u32 (!%p1151_p11), %s1192_s30, 6  ;;  %s165_s19 = scalar_lea.sflag (!%p1151_p11), [#allocation3], %s1192_s30 }
  0x4c   : > { %s1198_s24 = scalar_lea.vmem (!%p1151_p11), [#allocation2], %s733_s4  ;;  %p1319_p6 = scmp.ne.s32.totalorder (!%p1151_p11), %s1314_s20, 0 }
  0x51   : > { %993 = dma.done.wait (%p1319_p6), %s165_s19, 1024  }
  0x52   : > { %995 = vsyncadd (%p1319_p6), %s165_s19, 4294966272  ;;  %s734_s23 = sshll.u32 %s1192_s30, 2  ;;  %s174_s3 = scalar_lea.sflag [#allocation6], %s1192_s30 }
  0x53   : > { %s177_s5 = scalar_lea.vmem [#allocation5], %s734_s23 }
  0x54   : > { %997 = dma.done.wait (%p1319_p6), %s174_s3, 64  }
  0x55   : > { %999 = vsyncadd (%p1319_p6), %s174_s3, 4294967232  ;;  %v226_v0 = vlaneseq  ;;  %vm254_vm0 = vcmask 130048   ;;  %v206_v4 = vld [vmem:[%s1198_s24] sm:$0xff]  ;;  %v207_v5 = vld [vmem:[%s1198_s24 + $0x8] sm:$0xff]  ;;  %s202_s20 = scalar_lea.vmem [#allocation7], %s733_s4  ;;  %s762_s17 = sshll.u32 %s1065_s13, 10 }
  0x56   : > { %vm1212_vm1 = vmpackc.low %vm254_vm0, %vm254_vm0  ;;  %v214_v6 = vld [vmem:[%s177_s5] sm:$0x1]  ;;  %v807_v8 = vpack.c.bf16 %v207_v5, %v206_v4  ;;  %v208_v9 = vld [vmem:[%s1198_s24 + $0x10] sm:$0xff]  ;;  %s626_s8 = sshll.u32 %s202_s20, 4  ;;  %s1260_s26 = scalar_lea.hbm %s1310_s2, %s762_s17  ;;  %s1255_s8 = int_to_ptr.vmem [resolvable:$true] %s626_s8 }
  0x57   : > { %v227_v1 = vshrl.u32 %v226_v0, 7  ;;  %v218_v7 = vmax.f32 %v214_v6, 0.0001  ;;  %v209_v10 = vld [vmem:[%s1198_s24 + $0x18] sm:$0xff]  ;;  %v215_v11 = vld [vmem:[%s177_s5 + $0x1] sm:$0x1] }
  0x58   : > { %v219_v12 = vmax.f32 %v215_v11, 0.0001  ;;  %v813_v13 = vpack.c.bf16 %v209_v10, %v208_v9  ;;  %v210_v14 = vld [vmem:[%s1198_s24 + $0x20] sm:$0xff]  ;;  %v211_v15 = vld [vmem:[%s1198_s24 + $0x28] sm:$0xff]  ;;  %809 = vmatprep.subr.msk.bf16.mxu0 %vm1212_vm1, %v807_v8  ;;  %v212_v20 = vld [vmem:[%s1198_s24 + $0x30] sm:$0xff]  ;;  %s612_s13 = scalar_lea.sflag [#allocation4], %s1192_s30 }
  0x59   : > { %v228_v2 = vsub.s32 0, %v227_v1  ;;  %v216_v16 = vld [vmem:[%s177_s5 + $0x2] sm:$0x1]  ;;  %v819_v19 = vpack.c.bf16 %v211_v15, %v210_v14  ;;  %v213_v21 = vld [vmem:[%s1198_s24 + $0x38] sm:$0xff]  ;;  %v217_v22 = vld [vmem:[%s177_s5 + $0x3] sm:$0x1]  ;;  %812 = vmatpush3.bf16.xpose.msk.msra.mxu0 %vm1212_vm1, %v807_v8 }
  0x5a   : > { %v220_v18 = vmax.f32 %v216_v16, 0.0001  ;;  %815 = vmatprep.subr.msk.bf16.mxu1 %vm1212_vm1, %v813_v13  ;;  %v221_v24 = vmax.f32 %v217_v22, 0.0001  ;;  %v825_v25 = vpack.c.bf16 %v213_v21, %v212_v20  ;;  %s948_s27 = scalar_lea.vmem %s1255_s8, 1024  ;;  %p1322_p1 = scmp.ne.s32.totalorder %s1315_s21, 0 }
  0x5b   : > { %v229_v17 = vrot.slane %v218_v7, %v228_v2  ;;  %v233_v23 = vrot.slane %v219_v12, %v228_v2  ;;  %818 = vmatpush3.bf16.xpose.msk.msra.mxu1 %vm1212_vm1, %v813_v13  ;;  %821 = vmatprep.subr.msk.bf16.mxu0 %vm1212_vm1, %v819_v19  ;;  %p949_p13 = scmp.ne.s32.totalorder %s1255_s8, %s948_s27  ;;  %s1026_s29 = smov [#allocation7]  }
  0x5c   : > { %v237_v27 = vrot.slane %v220_v18, %v228_v2  ;;  %v241_v29 = vrot.slane %v221_v24, %v228_v2  ;;  %827 = vmatprep.subr.msk.bf16.mxu1 %vm1212_vm1, %v825_v25  ;;  %s952_s6 = sshll.u32 %s1026_s29, 4  ;;  %s953_s6 = int_to_ptr.vmem [resolvable:$false] %s952_s6 }
  0x5d   : > { %v246_v26 = vmul.f32 %v229_v17, %v206_v4  ;;  %v248_v28 = vmul.f32 %v233_v23, %v208_v9  ;;  %v247_v30 = vmul.f32 %v229_v17, %v207_v5  ;;  %v249_v31 = vmul.f32 %v233_v23, %v209_v10  ;;  %p950_p11 = pnand %p949_p13, %p1322_p1  ;;  %s954_s7 = scalar_lea.vmem %s953_s6, 2048 }
  0x5e   : > { %v250_v32 = vmul.f32 %v237_v27, %v210_v14  ;;  %v252_v33 = vmul.f32 %v241_v29, %v212_v20  ;;  %v251_v34 = vmul.f32 %v237_v27, %v211_v15  ;;  %v253_v35 = vmul.f32 %v241_v29, %v213_v21  ;;  %p955_p5 = scmp.lt.s32.totalorder %s1255_s8, %s953_s6  ;;  %p956_p7 = scmp.lt.s32.totalorder %s954_s7, %s948_s27 }
  0x5f   : > { %783 = vmatprep.mubr.msk.f32.mxu0 %vm254_vm0, %v246_v26  ;;  %790 = vmatprep.mubr.msk.f32.mxu1 %vm254_vm0, %v248_v28  ;;  %p951_p10 = pneg %p950_p11 }
  0x60   : > { %784 = vmatmul.mubr.msk.f32.vlgmr.msra.gmra.mrb[0].mxu0 %vm254_vm0, %v247_v30  ;;  %p957_p9 = por %p956_p7, %p955_p5 }
  0x61   : > { %824 = vmatpush3.bf16.xpose.msk.msra.mxu0 %vm1212_vm1, %v819_v19  ;;  %797 = vmatprep.mubr.msk.f32.mxu0 %vm254_vm0, %v250_v32 }
  0x62   : > { %791 = vmatmul.mubr.msk.f32.vlgmr.msra.gmra.mrb[0].mxu1 %vm254_vm0, %v249_v31  ;;  %p958_p3 = pnand %p957_p9, %p951_p10 }
  0x63   : > { %830 = vmatpush3.bf16.xpose.msk.msra.mxu1 %vm1212_vm1, %v825_v25  ;;  %804 = vmatprep.mubr.msk.f32.mxu1 %vm254_vm0, %v252_v33 }
  0x68   : > { %798 = vmatmul.mubr.msk.f32.vlgmr.msra.gmra.mrb[2].mxu0 %vm254_vm0, %v251_v34 }
  0x6a   : > { %805 = vmatmul.mubr.msk.f32.vlgmr.msra.gmra.mrb[2].mxu1 %vm254_vm0, %v253_v35 }
 0x133   : > { %v785_v36 = vpop.f32.mrb[0].mxu0 }
 0x134   : > { %604 = vst.msk [vmem:[%s202_s20 + $0x8] sm:$0xff] %vm254_vm0, %v785_v36  ;;  %v333_v38 = vpop.f32.mrb[1].mxu0 }
 0x135   : > { %v792_v37 = vpop.f32.mrb[0].mxu1  ;;  %603 = vst.msk [vmem:[%s202_s20] sm:$0xff] %vm254_vm0, %v333_v38 }
 0x136   : > { %606 = vst.msk [vmem:[%s202_s20 + $0x18] sm:$0xff] %vm254_vm0, %v792_v37  ;;  %v420_v39 = vpop.f32.mrb[1].mxu1 }
 0x137   : > { %605 = vst.msk [vmem:[%s202_s20 + $0x10] sm:$0xff] %vm254_vm0, %v420_v39 }
 0x13b   : > { %v799_v40 = vpop.f32.mrb[2].mxu0 }
 0x13c   : > { %608 = vst.msk [vmem:[%s202_s20 + $0x28] sm:$0xff] %vm254_vm0, %v799_v40  ;;  %v507_v42 = vpop.f32.mrb[3].mxu0 }
 0x13d   : > { %v806_v41 = vpop.f32.mrb[2].mxu1  ;;  %607 = vst.msk [vmem:[%s202_s20 + $0x20] sm:$0xff] %vm254_vm0, %v507_v42 }
 0x13e   : > { %610 = vst.msk [vmem:[%s202_s20 + $0x38] sm:$0xff] %vm254_vm0, %v806_v41  ;;  %v594_v43 = vpop.f32.mrb[3].mxu1 }
 0x13f   : > { %609 = vst.msk [vmem:[%s202_s20 + $0x30] sm:$0xff] %vm254_vm0, %v594_v43 }
 0x140   : > { %961 = shalt.err (!%p958_p3)
}
 0x141   : > { %s962_s14 = scalar_lea.hbm %s1260_s26, 1024  ;;  %s966_s19 = scalar_lea.hbm %s1310_s2, 2048 }
 0x142   : > { %p963_p12 = scmp.ne.s32.totalorder %s1260_s26, %s962_s14  ;;  %p967_p2 = scmp.lt.u32.totalorder %s1260_s26, %s1310_s2 }
 0x143   : > { %p968_p4 = scmp.lt.u32.totalorder %s966_s19, %s962_s14  ;;  %p970_p13 = scmp.lt.u32.totalorder %s962_s14, %s1260_s26 }
 0x144   : > { %p964_p8 = pnand %p963_p12, %p1322_p1 }
 0x145   : > { %p969_p6 = por %p968_p4, %p967_p2 }
 0x146   : > { %p965_p0 = pneg %p964_p8 }
 0x147   : > { %p971_p11 = por %p970_p13, %p969_p6 }
 0x149   : > { %p972_p10 = pnand %p971_p11, %p965_p0 }
 0x14b   : > { %975 = shalt.err (!%p972_p10)
}
 0x14c   : > { %s1027_s3 = smov 128   ;;  %s1028_s5 = smov 8  }
 0x14d   : > { %835 = dma.vmem_to_hbm [thread:$0]  (%p1322_p1), %s1255_s8, 1024, %s1260_s26, %s612_s13, %s1027_s3, %s1027_s3, %s1028_s5  }
 0x14e PF: > { %s641_s20 = sand.u32 1, %s1006_s9   ;;  %p1323_p5 = scmp.ne.s32.totalorder %s1316_s22, 0 }
 0x14f   : > { %p1324_p7 = scmp.ge.s32.totalorder %s1018_s12, 2  ;;  %s642_s17 = scalar_lea.sflag [#allocation4], %s641_s20 }
 0x151   : > { %p845_p9 = pnand %p1324_p7, %p1323_p5 }
 0x153   : > { %1001 = dma.done.wait (!%p845_p9), %s642_s17, 1024  }
 0x154   : > { %1003 = vsyncadd (!%p845_p9), %s642_s17, 4294966272  ;;  %p18_p3 = scmp.ge.s32.totalorder %s1069_s15, 4   ;;  %s1325_s9 = smov %s1010_s10 }
 0x155   : > { %s1326_s10 = smov %s1014_s11  ;;  %s1327_s11 = smov %s1081_s18 }
 0x156   : > { %s1328_s12 = smov %s1069_s15  ;;  %20 = sbr.rel (!%p18_p3) target bundleno = 7 (0x7), region = 86 }
 0x15d   :  { %647 = vsyncpa [#allocation3], 1 }
 0x15e   :  { %649 = vsyncpa [#allocation3 + $0x1], 1 }
 0x15f   :  { %650 = vsyncpa [#allocation6], 1 }
 0x160   :  { %652 = vsyncpa [#allocation6 + $0x1], 1 }
 0x161   :  { %653 = vsyncpa [#allocation4], 1 }
 0x162   :  { %655 = vsyncpa [#allocation4 + $0x1], 1 }

</bundles_post_ra>
